<compile_context>
chip_gen: v6e
topology: v6e:2x2x1
jax: 0.10.0
libtpu: 0.0.40
codegen_flags: <defaults>
</compile_context>

<pallas_src>
import jax
import jax.numpy as jnp
from jax.experimental import pallas as pl
from jax.experimental.pallas import tpu as pltpu

_LANE = 128
_SUB = 8  # f32 sublane count == partial-sum rows kept per grid step


def _cdiv(a, b):
    return -(-a // b)


def _round_up(a, b):
    return _cdiv(a, b) * b


def _vmem_capacity_bytes(default=64 * 1024 * 1024):
    # v7x: 64 MiB per TensorCore; v5e/v6e: 128 MiB.  Fall back to the
    # conservative v7x figure if the query is unavailable.
    try:
        info = pltpu.get_tpu_info()
        return int(getattr(info, "vmem_capacity_bytes", default))
    except Exception:
        return default


def _choose_cols(total, min_rows, cap=2048):
    """Largest multiple of 128 (<= cap) that divides `total` with >= min_rows rows.

    Returns 0 if no such width exists (caller falls back to a tiny zero-pad)."""
    c = min(cap, (total // _LANE) * _LANE)
    while c >= _LANE:
        if total % c == 0 and total // c >= min_rows:
            return c
        c -= _LANE
    return 0


def _make_union_kernel(rows, tr, need_mask):
    """Per-block soft-union partial sums.

    Block inputs are (tr, cols); the output block is (1, 8, 128) lane-dense
    partial sums.  All work here co-issues with the vector-load slots: the
    elementwise union, the optional ragged-tail mask, and the vreg adds that
    fold sublane groups of 8 and lane groups of 128.
    """

    def kernel(p_ref, t_ref, o_ref):
        p = p_ref[...].astype(jnp.float32)
        t = t_ref[...].astype(jnp.float32)
        u = p + t - p * t  # soft union, elementwise (VPU)
        if need_mask:
            # Ragged last row-block: rows past the true array extent contain
            # undefined data in VMEM; zero them (static threshold, pure VPU).
            row_ids = (
                jax.lax.broadcasted_iota(jnp.int32, u.shape, 0)
                + pl.program_id(0) * tr
            )
            u = jnp.where(row_ids < rows, u, 0.0)
        blk_rows, cols = u.shape
        # Layout-preserving splits (sublane dim at a multiple of 8, lane dim at
        # a multiple of 128); the sums are plain vreg adds on the VPU.
        s = jnp.sum(u.reshape(blk_rows // _SUB, _SUB, cols), axis=0)
        o_ref[0] = jnp.sum(s.reshape(_SUB, cols // _LANE, _LANE), axis=1)

    return kernel


def soft_union(network_output, target, num_class):
    """union(p, t) = mean over all elements of (p + t - p*t), computed in Pallas.

    num_class is unused by this elementwise soft union (the class axis is
    already explicit in the inputs); it is kept for API parity with the
    injected PyTorch union_func.
    """
    # TODO(synk): if the injected union_func actually depends on num_class,
    # thread it into the kernel (e.g. per-class reduction) instead of ignoring it.
    assert network_output.shape == target.shape
    del num_class

    total = int(network_output.size)
    p = network_output
    t = target

    # Native-dtype pass-through: bf16 inputs halve HBM traffic; the kernel
    # upcasts to f32 for accumulation.  No wrapper-side astype is emitted.
    itemsize = jnp.dtype(p.dtype).itemsize
    row_align = _SUB * max(1, 4 // itemsize)  # 8 for f32, 16 for bf16 packing

    cols = _choose_cols(total, row_align)
    if cols:
        # Hot path: free reshape, no HBM-copying pad.
        rows = total // cols
        p2 = p.reshape(rows, cols)
        t2 = t.reshape(rows, cols)
    else:
        # Fallback (size not a multiple of 128, or fewer than `row_align` full
        # rows): zero-pad the flat view.  union(0, 0) == 0 so the sum is
        # unaffected, and we divide by the true element count below.  For the
        # tiny-row case the copy is negligible; for the indivisible case it is
        # the price of a rectangular DMA layout.
        cols = 2048 if total >= row_align * 2048 else _LANE
        rows = _round_up(_cdiv(total, cols), row_align)
        pad = rows * cols - total
        p2 = jnp.pad(p.reshape(-1), (0, pad)).reshape(rows, cols)
        t2 = jnp.pad(t.reshape(-1), (0, pad)).reshape(rows, cols)

    # Block rows from per-generation VMEM capacity:
    #   128 MiB parts (v5e/v6e): 16 MiB per input buffer (4 x 16 = 64 MiB).
    #   64 MiB v7x:              ~12 MiB per input buffer (4 x 12 = 48 MiB).
    vmem_bytes = _vmem_capacity_bytes()
    if vmem_bytes >= (96 << 20):
        per_buf_bytes = vmem_bytes // 8
    else:
        per_buf_bytes = (vmem_bytes * 3) // 16
    tr = per_buf_bytes // (cols * itemsize)
    tr = max(row_align, (tr // row_align) * row_align)
    # Never let the block's row extent exceed the array's (rows >= row_align here).
    tr = min(tr, (rows // row_align) * row_align)

    grid_rows = _cdiv(rows, tr)
    # Keep >= 2 grid steps when there is enough data so the "parallel" grid
    # axis can shard across v7x's two TensorCores (neutral on v5e/v6e).
    if grid_rows == 1 and rows >= 2 * row_align:
        tr = max(row_align, _round_up(_cdiv(rows, 2), row_align))
        tr = min(tr, (rows // row_align) * row_align)
        grid_rows = _cdiv(rows, tr)

    need_mask = grid_rows * tr != rows

    block_bytes = tr * cols * itemsize
    out_block_bytes = _SUB * _LANE * 4
    needed = 4 * block_bytes + 2 * out_block_bytes + (2 << 20)
    vmem_limit = min(int(0.85 * vmem_bytes), max(needed + (4 << 20), 32 << 20))
    vmem_limit = max(vmem_limit, needed)

    cost = pl.CostEstimate(
        flops=3 * rows * cols,
        transcendentals=0,
        bytes_accessed=2 * rows * cols * itemsize + grid_rows * out_block_bytes,
    )

    partials = pl.pallas_call(
        _make_union_kernel(rows, tr, need_mask),
        out_shape=jax.ShapeDtypeStruct((grid_rows, _SUB, _LANE), jnp.float32),
        grid_spec=pltpu.PrefetchScalarGridSpec(
            num_scalar_prefetch=0,
            grid=(grid_rows,),
            in_specs=[
                pl.BlockSpec((tr, cols), lambda i: (i, 0)),
                pl.BlockSpec((tr, cols), lambda i: (i, 0)),
            ],
            out_specs=pl.BlockSpec((1, _SUB, _LANE), lambda i: (i, 0, 0)),
        ),
        compiler_params=pltpu.CompilerParams(
            dimension_semantics=("parallel",),  # each block owns its output slab
            vmem_limit_bytes=int(vmem_limit),
        ),
        cost_estimate=cost,
    )(p2, t2)

    # Tiny final cross-lane reduction (grid_rows * 8 * 128 elements) in JAX.
    return jnp.sum(partials) / jnp.float32(total)


class ExclusionLoss:
    """JAX port of Exclusion_loss: forward returns -union(output, target, num_class)."""

    def __init__(self, union_func):
        self.union = union_func

    def __call__(self, network_output, target, num_class):
        return -self.union(network_output, target, num_class)


if __name__ == "__main__":
    key = jax.random.PRNGKey(0)
    loss_fn = ExclusionLoss(soft_union)

    # Main demo: batch=2, num_class=4, spatial=16x16 (NCHW) -- exercises the
    # no-pad, no-mask hot path.
    n, c, h, w = 2, 4, 16, 16
    k1, k2, k3, k4 = jax.random.split(key, 4)
    logits = jax.random.normal(k1, (n, c, h, w), dtype=jnp.float32)
    probs = jax.nn.softmax(logits, axis=1)                          # network_output
    labels = jax.random.randint(k2, (n, h, w), 0, c)
    target = jax.nn.one_hot(labels, c, axis=1, dtype=jnp.float32)   # NCHW one-hot

    loss = loss_fn(probs, target, c)
    jax.block_until_ready(loss)
    ref = -jnp.mean(probs + target - probs * target)
    assert jnp.allclose(loss, ref, atol=1e-5), (loss, ref)

    # Second small check: a shape whose row count is ragged w.r.t. the block,
    # exercising the in-kernel masked tail (no wrapper pad).
    n2, c2, h2, w2 = 2, 4, 18, 16
    logits2 = jax.random.normal(k3, (n2, c2, h2, w2), dtype=jnp.float32)
    probs2 = jax.nn.softmax(logits2, axis=1)
    labels2 = jax.random.randint(k4, (n2, h2, w2), 0, c2)
    target2 = jax.nn.one_hot(labels2, c2, axis=1, dtype=jnp.float32)

    loss2 = loss_fn(probs2, target2, c2)
    jax.block_until_ready(loss2)
    ref2 = -jnp.mean(probs2 + target2 - probs2 * target2)
    assert jnp.allclose(loss2, ref2, atol=1e-5), (loss2, ref2)

    print("KERNEL_OK")
</pallas_src>

<mosaic_0001>
module attributes {stable_mosaic.version = 11 : i64} {
  func.func @kernel(%arg0: i32, %arg1: memref<8x256xf32, #tpu.memory_space<vmem>>, %arg2: memref<8x256xf32, #tpu.memory_space<vmem>>, %arg3: memref<1x8x128xf32, #tpu.memory_space<vmem>>) attributes {dimension_semantics = [#tpu.dimension_semantics<parallel>], iteration_bounds = array<i64: 1>, scalar_prefetch = 0 : i64, scratch_operands = 0 : i64, tpu.core_type = #tpu.core_type<tc>, window_params = [{transform_indices = @transform_0, window_bounds = array<i64: 8, 256>}, {transform_indices = @transform_1, window_bounds = array<i64: 8, 256>}, {transform_indices = @transform_2, window_bounds = array<i64: 1, 8, 128>}]} {
    %c0 = arith.constant 0 : index
    %c0_0 = arith.constant 0 : index
    %0 = vector.load %arg1[%c0, %c0_0] : memref<8x256xf32, #tpu.memory_space<vmem>>, vector<8x256xf32>
    %c0_1 = arith.constant 0 : index
    %c0_2 = arith.constant 0 : index
    %1 = vector.load %arg2[%c0_1, %c0_2] : memref<8x256xf32, #tpu.memory_space<vmem>>, vector<8x256xf32>
    %2 = arith.addf %0, %1 : vector<8x256xf32>
    %3 = arith.mulf %0, %1 : vector<8x256xf32>
    %4 = arith.subf %2, %3 : vector<8x256xf32>
    %5 = vector.shape_cast %4 : vector<8x256xf32> to vector<1x8x256xf32>
    %cst = arith.constant dense<0.000000e+00> : vector<8x256xf32>
    %6 = vector.multi_reduction <add>, %5, %cst [0] : vector<1x8x256xf32> to vector<8x256xf32>
    %7 = vector.shape_cast %6 : vector<8x256xf32> to vector<8x2x128xf32>
    %cst_3 = arith.constant dense<0.000000e+00> : vector<8x128xf32>
    %8 = vector.multi_reduction <add>, %7, %cst_3 [1] : vector<8x2x128xf32> to vector<8x128xf32>
    %c0_4 = arith.constant 0 : index
    %c0_5 = arith.constant 0 : index
    %c0_6 = arith.constant 0 : index
    %9 = vector.load %arg3[%c0_4, %c0_5, %c0_6] : memref<1x8x128xf32, #tpu.memory_space<vmem>>, vector<1x8x128xf32>
    %10 = vector.shape_cast %9 : vector<1x8x128xf32> to vector<8x128xf32>
    %11 = vector.shape_cast %8 : vector<8x128xf32> to vector<1x8x128xf32>
    tpu.vector_store %arg3[%c0_4, %c0_5, %c0_6], %11 {strides = array<i32>} : memref<1x8x128xf32, #tpu.memory_space<vmem>>, vector<1x8x128xf32>,
    return
  }
  func.func @transform_0(%arg0: i32) -> (i32, i32) {
    %c0_i32 = arith.constant 0 : i32
    %c0_i32_0 = arith.constant 0 : i32
    return %arg0, %c0_i32 : i32, i32
  }
  func.func @transform_1(%arg0: i32) -> (i32, i32) {
    %c0_i32 = arith.constant 0 : i32
    %c0_i32_0 = arith.constant 0 : i32
    return %arg0, %c0_i32 : i32, i32
  }
  func.func @transform_2(%arg0: i32) -> (i32, i32, i32) {
    %c0_i32 = arith.constant 0 : i32
    %c0_i32_0 = arith.constant 0 : i32
    %c0_i32_1 = arith.constant 0 : i32
    return %arg0, %c0_i32, %c0_i32_0 : i32, i32, i32
  }
}

</mosaic_0001>

<bundles_post_ra>
// kernel: tpu_custom_call.1
= control target key start
LH: loop header
LB: loop body
LE: loop exit
PB: predicated region body
PF: predicated region fallthrough
CT: control target
= control target key end

     0   :  { %7 = vsyncpa [#allocation3], 0  ;;  %s323_s0 = inlined_call_operand.hbm [shape: f32[8,256], index: 0, kind: input, shape index: {}]   ;;  %s324_s1 = inlined_call_operand.hbm [shape: f32[8,256], index: 1, kind: input, shape index: {}]   ;;  %s325_s2 = inlined_call_operand.hbm [shape: f32[1,8,128], index: 2, kind: output, shape index: {}]  }
   0x1   :  { %8 = vsyncpa [#allocation6], 0 }
   0x2   :  { %9 = vsyncpa [#allocation4], 0  ;;  %s283_s9 = smov [#allocation2]   ;;  %s284_s11 = smov [#allocation5]  }
   0x3   :  { %s16_s10 = sshll.u32 %s283_s9, 4  ;;  %s26_s12 = sshll.u32 %s284_s11, 4  ;;  %s17_s10 = int_to_ptr.vmem [resolvable:$true] %s16_s10  ;;  %s27_s12 = int_to_ptr.vmem [resolvable:$true] %s26_s12 }
   0x4   :  { %s225_s13 = scalar_lea.vmem %s17_s10, 256  ;;  %p230_p1 = scmp.lt.s32.totalorder %s17_s10, %s17_s10 }
   0x5   :  { %p226_p0 = scmp.ne.s32.totalorder %s17_s10, %s225_s13  ;;  %p231_p2 = scmp.lt.s32.totalorder %s225_s13, %s225_s13 }
   0x7   :  { %p232_p3 = por %p231_p2, %p230_p1 }
   0x9   :  { %p233_p4 = pnand %p232_p3, %p226_p0 }
   0xb   :  { %236 = shalt.err (!%p233_p4)
}
   0xc   :  { %19 = dma.hbm_to_vmem [thread:$0]  %s323_s0, 256, %s17_s10, [#allocation3]  }
   0xd   :  { %s245_s16 = scalar_lea.vmem %s27_s12, 256  ;;  %p250_p6 = scmp.lt.s32.totalorder %s27_s12, %s27_s12 }
   0xe   :  { %p246_p5 = scmp.ne.s32.totalorder %s27_s12, %s245_s16  ;;  %p251_p7 = scmp.lt.s32.totalorder %s245_s16, %s245_s16 }
  0x10   :  { %p252_p8 = por %p251_p7, %p250_p6 }
  0x12   :  { %p253_p9 = pnand %p252_p8, %p246_p5 }
  0x14   :  { %256 = shalt.err (!%p253_p9)
}
  0x15   :  { %29 = dma.hbm_to_vmem [thread:$0]  %s324_s1, 256, %s27_s12, [#allocation6]  }
  0x16   :  { %277 = dma.done.wait [#allocation3], 256  }
  0x17   :  { %278 = vsyncadd [#allocation3], 4294967040 }
  0x18   :  { %279 = dma.done.wait [#allocation6], 256  }
  0x19   :  { %280 = vsyncadd [#allocation6], 4294967040  ;;  %v52_v0 = vlaneseq  ;;  %v285_v1 = vmov 1983009808   ;;  %v286_v5 = vmov 1934713408  }
  0x1a   :  { %v50_v2 = vunpack.c.l.s4 %v285_v1  ;;  %v81_v6 = vunpack.c.l.s4 %v286_v5  ;;  %v36_v7 = vld [vmem:[#allocation2] sm:$0xff]  ;;  %v37_v8 = vld [vmem:[#allocation2 + $0x8] sm:$0xff]  ;;  %v38_v9 = vld [vmem:[#allocation5] sm:$0xff]  ;;  %v287_v19 = vmov 0.0   ;;  %vm114_vm0 = vcmask 1041408   ;;  %s288_s0 = smov [#allocation7]  }
  0x1b   :  { %v53_v4 = vshrl.u32 %v52_v0, 7  ;;  %v39_v10 = vld [vmem:[#allocation5 + $0x8] sm:$0xff]  ;;  %v40_v11 = vadd.f32 %v38_v9, %v36_v7  ;;  %v42_v12 = vmul.f32 %v38_v9, %v36_v7  ;;  %vm179_vm1 = vcmask 1041409   ;;  %s201_s1 = sshll.u32 %s288_s0, 4  ;;  %s202_s1 = int_to_ptr.vmem [resolvable:$true] %s201_s1 }
  0x1c   :  { %v51_v3 = vunpack.c.0.s8 %v50_v2  ;;  %v41_v14 = vadd.f32 %v39_v10, %v37_v8  ;;  %v43_v15 = vmul.f32 %v39_v10, %v37_v8  ;;  %v82_v16 = vunpack.c.0.s8 %v81_v6  ;;  %s257_s19 = scalar_lea.vmem %s202_s1, 128  ;;  %p262_p11 = scmp.lt.s32.totalorder %s202_s1, %s202_s1 }
  0x1d   :  { %v44_v17 = vsub.f32 %v40_v11, %v42_v12  ;;  %vm181_vm2 = vcmask 1042434   ;;  %vm183_vm3 = vcmask 1043459   ;;  %vm185_vm4 = vcmask 1044484   ;;  %p258_p10 = scmp.ne.s32.totalorder %s202_s1, %s257_s19  ;;  %p263_p12 = scmp.lt.s32.totalorder %s257_s19, %s257_s19 }
  0x1e   :  { %v54_v13 = vsub.s32 %v51_v3, %v53_v4  ;;  %v45_v18 = vsub.f32 %v41_v14, %v43_v15  ;;  %v85_v24 = vsub.s32 %v82_v16, %v53_v4  ;;  %vm187_vm5 = vcmask 1045509  }
  0x1f   :  { %v48_v20 = vcombine.high %v44_v17, %v287_v19  ;;  %vm189_vm6 = vcmask 1046534   ;;  %vm191_vm7 = vcmask 1047559   ;;  %p264_p13 = por %p263_p12, %p262_p11 }
  0x20   :  { %v55_v21 = vrot.slane %v44_v17, %v54_v13  ;;  %v63_v22 = vcombine.high %v45_v18, %v287_v19  ;;  %v70_v23 = vrot.slane %v45_v18, %v54_v13 }
  0x21   :  { %v62_v25 = vrot.slane %v48_v20, %v54_v13  ;;  %p265_p0 = pnand %p264_p13, %p258_p10 }
  0x22   :  { %v77_v26 = vrot.slane %v63_v22, %v54_v13  ;;  %v78_v27 = vcombine.low %v55_v21, %v70_v23  ;;  %v79_v28 = vcombine.high %v55_v21, %v70_v23 }
  0x24   :  { %v86_v29 = vrot.slane %v78_v27, %v85_v24  ;;  %v93_v30 = vrot.slane %v79_v28, %v85_v24  ;;  %v94_v31 = vcombine.low %v62_v25, %v77_v26  ;;  %v95_v32 = vcombine.high %v62_v25, %v77_v26 }
  0x26   :  { %v102_v33 = vrot.slane %v94_v31, %v85_v24  ;;  %v109_v34 = vrot.slane %v95_v32, %v85_v24  ;;  %v110_v35 = vcombine.high %v86_v29, %v287_v19  ;;  %v111_v36 = vcombine.high %v93_v30, %v287_v19 }
  0x27   :  { %v115_v37 = vsel %vm114_vm0, %v86_v29, 0.0  ;;  %v129_v38 = vsel %vm114_vm0, %v93_v30, 0.0 }
  0x28   :  { %v112_v39 = vcombine.high %v102_v33, %v287_v19  ;;  %v113_v40 = vcombine.high %v109_v34, %v287_v19  ;;  %v116_v41 = vrot.slane %v115_v37, 4  ;;  %v122_v42 = vsel %vm114_vm0, %v110_v35, 0.0 }
  0x29   :  { %v123_v43 = vrot.slane %v122_v42, 4  ;;  %v130_v44 = vrot.slane %v129_v38, 4  ;;  %v136_v45 = vsel %vm114_vm0, %v111_v36, 0.0  ;;  %v143_v46 = vsel %vm114_vm0, %v102_v33, 0.0 }
  0x2a   :  { %v117_v47 = vadd.f32 %v116_v41, %v115_v37  ;;  %v137_v48 = vrot.slane %v136_v45, 4  ;;  %v144_v49 = vrot.slane %v143_v46, 4  ;;  %v150_v50 = vsel %vm114_vm0, %v112_v39, 0.0 }
  0x2b   :  { %v124_v51 = vadd.f32 %v123_v43, %v122_v42  ;;  %v131_v52 = vadd.f32 %v130_v44, %v129_v38  ;;  %v151_v53 = vrot.slane %v150_v50, 4  ;;  %v157_v54 = vsel %vm114_vm0, %v109_v34, 0.0 }
  0x2c   :  { %v118_v55 = vrot.slane %v117_v47, 2  ;;  %v138_v56 = vadd.f32 %v137_v48, %v136_v45  ;;  %v145_v57 = vadd.f32 %v144_v49, %v143_v46  ;;  %v158_v58 = vrot.slane %v157_v54, 4 }
  0x2d   :  { %v125_v59 = vrot.slane %v124_v51, 2  ;;  %v132_v60 = vrot.slane %v131_v52, 2  ;;  %v152_v61 = vadd.f32 %v151_v53, %v150_v50  ;;  %v164_v62 = vsel %vm114_vm0, %v113_v40, 0.0 }
  0x2e   :  { %v119_v63 = vadd.f32 %v118_v55, %v117_v47  ;;  %v139_v0 = vrot.slane %v138_v56, 2  ;;  %v146_v1 = vrot.slane %v145_v57, 2  ;;  %v159_v2 = vadd.f32 %v158_v58, %v157_v54 }
  0x2f   :  { %v126_v3 = vadd.f32 %v125_v59, %v124_v51  ;;  %v133_v4 = vadd.f32 %v132_v60, %v131_v52  ;;  %v153_v5 = vrot.slane %v152_v61, 2  ;;  %v165_v6 = vrot.slane %v164_v62, 4 }
  0x30   :  { %v120_v7 = vrot.slane %v119_v63, 1  ;;  %v140_v8 = vadd.f32 %v139_v0, %v138_v56  ;;  %v147_v9 = vadd.f32 %v146_v1, %v145_v57  ;;  %v160_v10 = vrot.slane %v159_v2, 2 }
  0x31   :  { %v127_v11 = vrot.slane %v126_v3, 1  ;;  %v134_v12 = vrot.slane %v133_v4, 1  ;;  %v154_v13 = vadd.f32 %v153_v5, %v152_v61  ;;  %v166_v14 = vadd.f32 %v165_v6, %v164_v62 }
  0x32   :  { %v121_v15 = vadd.f32 %v120_v7, %v119_v63  ;;  %v141_v16 = vrot.slane %v140_v8, 1  ;;  %v148_v17 = vrot.slane %v147_v9, 1  ;;  %v161_v18 = vadd.f32 %v160_v10, %v159_v2 }
  0x33   :  { %v128_v19 = vadd.f32 %v127_v11, %v126_v3  ;;  %v135_v20 = vadd.f32 %v134_v12, %v133_v4  ;;  %v155_v21 = vrot.slane %v154_v13, 1  ;;  %v167_v22 = vrot.slane %v166_v14, 2 }
  0x34   :  { %v142_v23 = vadd.f32 %v141_v16, %v140_v8  ;;  %v149_v24 = vadd.f32 %v148_v17, %v147_v9  ;;  %v162_v25 = vrot.slane %v161_v18, 1 }
  0x35   :  { %v156_v26 = vadd.f32 %v155_v21, %v154_v13  ;;  %v168_v27 = vadd.f32 %v167_v22, %v166_v14  ;;  %v180_v28 = vsel %vm179_vm1, %v128_v19, %v121_v15 }
  0x36   :  { %v163_v29 = vadd.f32 %v162_v25, %v161_v18  ;;  %v182_v30 = vsel %vm181_vm2, %v135_v20, %v180_v28 }
  0x37   :  { %v169_v31 = vrot.slane %v168_v27, 1  ;;  %v184_v32 = vsel %vm183_vm3, %v142_v23, %v182_v30 }
  0x38   :  { %v186_v33 = vsel %vm185_vm4, %v149_v24, %v184_v32 }
  0x39   :  { %v170_v34 = vadd.f32 %v169_v31, %v168_v27  ;;  %v188_v35 = vsel %vm187_vm5, %v156_v26, %v186_v33 }
  0x3a   :  { %v190_v36 = vsel %vm189_vm6, %v163_v29, %v188_v35 }
  0x3b   :  { %v192_v37 = vsel %vm191_vm7, %v170_v34, %v190_v36 }
  0x3c   :  { %194 = vst [vmem:[#allocation7] sm:$0xff] %v192_v37 }
  0x3d   :  { %268 = shalt.err (!%p265_p0)
}
  0x3e   :  { %204 = dma.vmem_to_hbm [thread:$0]  %s202_s1, 128, %s325_s2, [#allocation4]  }
  0x3f   :  { %281 = dma.done.wait [#allocation4], 128  }
  0x40   :  { %282 = vsyncadd [#allocation4], 4294967168 }
  0x41   :  { %208 = vsyncpa [#allocation3], 1 }
  0x42   :  { %209 = vsyncpa [#allocation6], 1 }
  0x43   :  { %210 = vsyncpa [#allocation4], 1 }

</bundles_post_ra>
